<compile_context>
chip_gen: v5e
topology: v5e:2x2
jax: 0.10.0
libtpu: 0.0.40
codegen_flags: <defaults>
</compile_context>

<pallas_src>
import functools

import jax
import jax.numpy as jnp
from jax import lax
from jax.experimental import pallas as pl
from jax.experimental.pallas import tpu as pltpu


def _round_up(x, m):
    return (x + m - 1) // m * m


# ---------------------------------------------------------------------------
# Kernel 1: fused 3x3 conv (one MXU matmul per spatial tile) + streaming
# GroupNorm statistics.  Emits raw conv tiles and, per sample, the folded
# per-channel affine parameters [scale, shift] on the last tile.
# ---------------------------------------------------------------------------
def _conv_stats_kernel(p_ref, w_ref, prm_ref, m_cg_ref, m_gc_ref,
                       raw_ref, par_ref, sum_ref, sqs_ref,
                       *, HW, TQ, cg, eps, pad_tail):
    # p_ref:    (1, K9p, TQ)   bf16 im2col patches for this spatial tile
    # w_ref:    (cout, K9p)    bf16 conv weights (tap-major K ordering)
    # prm_ref:  (cout, 3)      f32 packed [bias, gamma, beta]
    # m_cg_ref: (cout, groups) f32 channel<-group membership (broadcast)
    # m_gc_ref: (groups, cout) f32 group<-channel membership (reduce)
    # raw_ref:  (1, cout, TQ)  raw conv output tile (lane-dense, per-q write)
    # par_ref:  (1, cout, 2)   per-channel [scale, shift], resident across q
    # sum_ref, sqs_ref: (cout, 1) f32 running per-channel sum / sum-of-squares
    q = pl.program_id(1)
    nq = pl.num_programs(1)

    @pl.when(q == 0)
    def _():
        sum_ref[...] = jnp.zeros_like(sum_ref)
        sqs_ref[...] = jnp.zeros_like(sqs_ref)

    bias = prm_ref[:, 0:1]                                    # (cout, 1)

    # ---- fused 3x3 conv: one MXU matmul, bf16 operands, f32 accumulate ----
    acc = jnp.dot(w_ref[...], p_ref[0],
                  preferred_element_type=jnp.float32) + bias  # (cout, TQ)

    # Running per-channel statistics (padded lanes masked out of stats only).
    if pad_tail:
        col = lax.broadcasted_iota(jnp.int32, (1, TQ), 1) + q * TQ
        acc_s = jnp.where(col < HW, acc, 0.0)
    else:
        acc_s = acc
    sum_ref[...] += jnp.sum(acc_s, axis=1, keepdims=True)
    sqs_ref[...] += jnp.sum(acc_s * acc_s, axis=1, keepdims=True)

    # Lane-dense tiled writeback of the raw conv activations.
    raw_ref[0, :, :] = acc.astype(raw_ref.dtype)

    # ---- fold GroupNorm into per-channel [scale, shift] on the last tile ---
    @pl.when(q == nq - 1)
    def _():
        count = jnp.float32(HW * cg)
        g_sum = jnp.dot(m_gc_ref[...], sum_ref[...],
                        preferred_element_type=jnp.float32)   # (G, 1)
        g_sqs = jnp.dot(m_gc_ref[...], sqs_ref[...],
                        preferred_element_type=jnp.float32)   # (G, 1)
        g_mean = g_sum / count
        g_var = g_sqs / count - g_mean * g_mean
        g_inv = lax.rsqrt(g_var + eps)
        mean_c = jnp.dot(m_cg_ref[...], g_mean,
                         preferred_element_type=jnp.float32)  # (cout, 1)
        inv_c = jnp.dot(m_cg_ref[...], g_inv,
                        preferred_element_type=jnp.float32)   # (cout, 1)
        gamma = prm_ref[:, 1:2]
        beta = prm_ref[:, 2:3]
        scale_c = inv_c * gamma
        shift_c = beta - mean_c * scale_c
        par_ref[0, :, :] = jnp.concatenate([scale_c, shift_c], axis=1)


# ---------------------------------------------------------------------------
# Kernel 2: per-tile GroupNorm affine + Mish (element-wise, fully pipelined).
# ---------------------------------------------------------------------------
def _norm_mish_kernel(raw_ref, par_ref, o_ref):
    scale = par_ref[0, :, 0:1]                                # (cout, 1)
    shift = par_ref[0, :, 1:2]                                # (cout, 1)
    y = raw_ref[0].astype(jnp.float32) * scale + shift        # (cout, TQ)

    # Mish: y * tanh(softplus(y)) with torch threshold=20, rewritten as the
    # rational form: 1 exp + 1 approx reciprocal (EUP), no log1p / tanh.
    t = jnp.exp(jnp.minimum(y, 20.0))
    u = (1.0 + t) * (1.0 + t)
    mish = jnp.where(y > 20.0, y,
                     y * (u - 1.0) * pl.reciprocal(u + 1.0, approx=True))
    o_ref[0, :, :] = mish.astype(o_ref.dtype)


def _pick_tq(HWp, K9p, cout, raw_itemsize, budget_bytes=20 * 1024 * 1024):
    """Largest lane tile (multiple of 128 dividing HWp) within a VMEM budget,
    preferring >= 2 tiles so the input/output DMA pipeline has depth."""
    def vmem_est(tq):
        conv_call = (2 * K9p * tq * 2            # double-buffered patches
                     + cout * K9p * 2            # weights
                     + 2 * cout * tq * raw_itemsize)
        norm_call = 2 * cout * tq * raw_itemsize + 2 * cout * tq * 4
        return max(conv_call, norm_call)

    cands = [c for c in (4096, 2048, 1024, 512, 256, 128)
             if HWp % c == 0 and vmem_est(c) <= budget_bytes]
    if not cands:
        return 128
    multi = [c for c in cands if HWp // c >= 2]
    return multi[0] if multi else cands[0]


def block_forward(x_nchw, conv_w, conv_b, gamma, beta, *, groups=8, eps=1e-5,
                  raw_dtype=jnp.float32):
    """x_nchw: (N, Cin, H, W); conv_w: (Cout, Cin, 3, 3) torch layout."""
    N, cin, H, W = x_nchw.shape
    cout = conv_w.shape[0]
    assert cout % groups == 0
    cg = cout // groups
    HW = H * W
    K9 = 9 * cin
    K9p = _round_up(K9, 16)            # bf16 sublane packing for the K dim
    HWp = _round_up(HW, 128)           # lane-dense, unmasked output stores
    pad_tail = HWp != HW

    raw_itemsize = jnp.dtype(raw_dtype).itemsize
    TQ = _pick_tq(HWp, K9p, cout, raw_itemsize)
    Q = HWp // TQ
    vmem_lim = 48 * 1024 * 1024        # safe on v5e/v6e (128 MiB) and v7x (64 MiB)

    # --- wrapper-side im2col: cast to bf16 BEFORE slicing/concatenating -----
    xp = jnp.pad(x_nchw, ((0, 0), (0, 0), (1, 1), (1, 1))).astype(jnp.bfloat16)
    taps = [xp[:, :, kh:kh + H, kw:kw + W]
            for kh in range(3) for kw in range(3)]
    patches = jnp.concatenate(taps, axis=1).reshape(N, K9, HW)
    patches = jnp.pad(patches, ((0, 0), (0, K9p - K9), (0, HWp - HW)))

    # (Cout, Cin, 3, 3) -> (Cout, kh, kw, Cin) -> (Cout, K9p), bf16
    w_flat = jnp.transpose(conv_w, (0, 2, 3, 1)).reshape(cout, K9)
    w_flat = jnp.pad(w_flat.astype(jnp.bfloat16), ((0, 0), (0, K9p - K9)))

    # packed per-channel params [bias, gamma, beta]
    prm = jnp.stack([conv_b, gamma, beta], axis=1).astype(jnp.float32)

    # precomputed channel<->group membership matrices
    ch = jnp.arange(cout)
    m_cg = (ch[:, None] // cg == jnp.arange(groups)[None, :]).astype(jnp.float32)
    m_gc = m_cg.T

    # ---------------- pass 1: conv + GroupNorm statistics -------------------
    kernel1 = functools.partial(_conv_stats_kernel, HW=HW, TQ=TQ, cg=cg,
                                eps=eps, pad_tail=pad_tail)
    flops1 = int(2 * N * cout * K9p * HWp + 4 * N * cout * HWp)
    bytes1 = int(N * K9p * HWp * 2 + cout * K9p * 2
                 + N * cout * HWp * raw_itemsize + N * cout * 2 * 4)

    raw, par = pl.pallas_call(
        kernel1,
        out_shape=(jax.ShapeDtypeStruct((N, cout, HWp), raw_dtype),
                   jax.ShapeDtypeStruct((N, cout, 2), jnp.float32)),
        grid_spec=pltpu.PrefetchScalarGridSpec(
            num_scalar_prefetch=0,
            grid=(N, Q),
            in_specs=[
                pl.BlockSpec((1, K9p, TQ), lambda n, q: (n, 0, q)),
                pl.BlockSpec((cout, K9p), lambda n, q: (0, 0)),
                pl.BlockSpec((cout, 3), lambda n, q: (0, 0)),
                pl.BlockSpec((cout, groups), lambda n, q: (0, 0)),
                pl.BlockSpec((groups, cout), lambda n, q: (0, 0)),
            ],
            out_specs=[
                pl.BlockSpec((1, cout, TQ), lambda n, q: (n, 0, q)),
                pl.BlockSpec((1, cout, 2), lambda n, q: (n, 0, 0)),
            ],
            scratch_shapes=[pltpu.VMEM((cout, 1), jnp.float32),
                            pltpu.VMEM((cout, 1), jnp.float32)],
        ),
        compiler_params=pltpu.CompilerParams(
            dimension_semantics=("parallel", "arbitrary"),
            vmem_limit_bytes=vmem_lim),
        cost_estimate=pl.CostEstimate(flops=flops1, transcendentals=0,
                                      bytes_accessed=bytes1),
    )(patches, w_flat, prm, m_cg, m_gc)

    # ---------------- pass 2: normalize + Mish (tiled, fully parallel) ------
    flops2 = int(10 * N * cout * HWp)
    trans2 = int(2 * N * cout * HWp)
    bytes2 = int(N * cout * HWp * (raw_itemsize + 4) + N * cout * 2 * 4)

    out = pl.pallas_call(
        _norm_mish_kernel,
        out_shape=jax.ShapeDtypeStruct((N, cout, HWp), jnp.float32),
        grid_spec=pltpu.PrefetchScalarGridSpec(
            num_scalar_prefetch=0,
            grid=(N, Q),
            in_specs=[
                pl.BlockSpec((1, cout, TQ), lambda n, q: (n, 0, q)),
                pl.BlockSpec((1, cout, 2), lambda n, q: (n, 0, 0)),
            ],
            out_specs=pl.BlockSpec((1, cout, TQ), lambda n, q: (n, 0, q)),
        ),
        compiler_params=pltpu.CompilerParams(
            dimension_semantics=("parallel", "parallel"),
            vmem_limit_bytes=vmem_lim),
        cost_estimate=pl.CostEstimate(flops=flops2, transcendentals=trans2,
                                      bytes_accessed=bytes2),
    )(raw, par)

    # (N, Cout, HWp) -> drop lane padding -> (N, Cout, H, W): free reshape
    return out[:, :, :HW].reshape(N, cout, H, W)


def _reference(x, conv_w, conv_b, gamma, beta, groups=8, eps=1e-5):
    # pure-JAX reference, conv in bf16 operands / f32 accumulate (matches kernel)
    y = lax.conv_general_dilated(
        x.astype(jnp.bfloat16), conv_w.astype(jnp.bfloat16),
        window_strides=(1, 1), padding=((1, 1), (1, 1)),
        dimension_numbers=("NCHW", "OIHW", "NCHW"),
        preferred_element_type=jnp.float32)
    y = y + conv_b.reshape(1, -1, 1, 1)
    N, C, H, W = y.shape
    cg = C // groups
    yr = y.reshape(N, groups, cg, H, W)
    mean = yr.mean(axis=(2, 3, 4), keepdims=True)
    var = ((yr - mean) ** 2).mean(axis=(2, 3, 4), keepdims=True)
    yn = ((yr - mean) / jnp.sqrt(var + eps)).reshape(N, C, H, W)
    yn = yn * gamma.reshape(1, -1, 1, 1) + beta.reshape(1, -1, 1, 1)
    return yn * jnp.tanh(jax.nn.softplus(yn))


if __name__ == "__main__":
    key = jax.random.PRNGKey(0)
    k1, k2, k3, k4, k5 = jax.random.split(key, 5)

    N, Cin, H, W = 2, 4, 16, 16
    Cout, G = 16, 8

    x = jax.random.normal(k1, (N, Cin, H, W), jnp.float32)
    conv_w = 0.1 * jax.random.normal(k2, (Cout, Cin, 3, 3), jnp.float32)
    conv_b = 0.1 * jax.random.normal(k3, (Cout,), jnp.float32)
    gamma = 1.0 + 0.1 * jax.random.normal(k4, (Cout,), jnp.float32)
    beta = 0.1 * jax.random.normal(k5, (Cout,), jnp.float32)

    out = block_forward(x, conv_w, conv_b, gamma, beta, groups=G)
    out = jax.block_until_ready(out)

    ref = _reference(x, conv_w, conv_b, gamma, beta, groups=G)
    assert out.shape == (N, Cout, H, W)
    err = float(jnp.max(jnp.abs(out - ref)))
    assert err < 2e-2, f"mismatch vs reference: {err}"

    print("KERNEL_OK")
</pallas_src>

<mosaic_0001>
module attributes {stable_mosaic.version = 11 : i64} {
  func.func @_conv_stats_kernel(%arg0: i32, %arg1: i32, %arg2: memref<1x48x128xbf16, #tpu.memory_space<vmem>>, %arg3: memref<16x48xbf16, #tpu.memory_space<vmem>>, %arg4: memref<16x3xf32, #tpu.memory_space<vmem>>, %arg5: memref<16x8xf32, #tpu.memory_space<vmem>>, %arg6: memref<8x16xf32, #tpu.memory_space<vmem>>, %arg7: memref<1x16x128xf32, #tpu.memory_space<vmem>>, %arg8: memref<1x16x2xf32, #tpu.memory_space<vmem>>, %arg9: memref<16x1xf32, #tpu.memory_space<vmem>>, %arg10: memref<16x1xf32, #tpu.memory_space<vmem>>) attributes {dimension_semantics = [#tpu.dimension_semantics<parallel>, #tpu.dimension_semantics<arbitrary>], iteration_bounds = array<i64: 2, 2>, scalar_prefetch = 0 : i64, scratch_operands = 2 : i64, tpu.core_type = #tpu.core_type<tc>, window_params = [{transform_indices = @transform_0, window_bounds = array<i64: 1, 48, 128>}, {pipeline_mode = #tpu.pipeline_mode<synchronous>, transform_indices = @transform_1, window_bounds = array<i64: 16, 48>}, {pipeline_mode = #tpu.pipeline_mode<synchronous>, transform_indices = @transform_2, window_bounds = array<i64: 16, 3>}, {pipeline_mode = #tpu.pipeline_mode<synchronous>, transform_indices = @transform_3, window_bounds = array<i64: 16, 8>}, {pipeline_mode = #tpu.pipeline_mode<synchronous>, transform_indices = @transform_4, window_bounds = array<i64: 8, 16>}, {transform_indices = @transform_5, window_bounds = array<i64: 1, 16, 128>}, {transform_indices = @transform_6, window_bounds = array<i64: 1, 16, 2>}]} {
    %c0_i32 = arith.constant 0 : i32
    %0 = arith.cmpi eq, %arg1, %c0_i32 : i32
    %1 = arith.extui %0 : i1 to i32
    %c0_i32_0 = arith.constant 0 : i32
    %2 = arith.cmpi ne, %1, %c0_i32_0 : i32
    scf.if %2 {
      %cst_21 = arith.constant 0.000000e+00 : f32
      %27 = vector.broadcast %cst_21 : f32 to vector<16x1xf32>
      %c0_22 = arith.constant 0 : index
      %c0_23 = arith.constant 0 : index
      %28 = vector.load %arg9[%c0_22, %c0_23] : memref<16x1xf32, #tpu.memory_space<vmem>>, vector<16x1xf32>
      tpu.vector_store %arg9[%c0_22, %c0_23], %27 {strides = array<i32>} : memref<16x1xf32, #tpu.memory_space<vmem>>, vector<16x1xf32>,
      %cst_24 = arith.constant 0.000000e+00 : f32
      %29 = vector.broadcast %cst_24 : f32 to vector<16x1xf32>
      %c0_25 = arith.constant 0 : index
      %c0_26 = arith.constant 0 : index
      %30 = vector.load %arg10[%c0_25, %c0_26] : memref<16x1xf32, #tpu.memory_space<vmem>>, vector<16x1xf32>
      tpu.vector_store %arg10[%c0_25, %c0_26], %29 {strides = array<i32>} : memref<16x1xf32, #tpu.memory_space<vmem>>, vector<16x1xf32>,
    } else {
    }
    %c0 = arith.constant 0 : index
    %c0_1 = arith.constant 0 : index
    %3 = vector.load %arg4[%c0, %c0_1] : memref<16x3xf32, #tpu.memory_space<vmem>>, vector<16x1xf32>
    %c0_2 = arith.constant 0 : index
    %c0_3 = arith.constant 0 : index
    %4 = vector.load %arg3[%c0_2, %c0_3] : memref<16x48xbf16, #tpu.memory_space<vmem>>, vector<16x48xbf16>
    %c0_4 = arith.constant 0 : index
    %c0_5 = arith.constant 0 : index
    %c0_6 = arith.constant 0 : index
    %5 = vector.load %arg2[%c0_4, %c0_5, %c0_6] : memref<1x48x128xbf16, #tpu.memory_space<vmem>>, vector<1x48x128xbf16>
    %6 = vector.shape_cast %5 : vector<1x48x128xbf16> to vector<48x128xbf16>
    %cst = arith.constant dense<0.000000e+00> : vector<16x128xf32>
    %7 = tpu.matmul %4, %6, %cst {dimension_numbers = #tpu.dot_dimension_numbers<[1], [0], [0], [1], [0, 0, 1, 1], [], []>} : vector<16x48xbf16>, vector<48x128xbf16>, vector<16x128xf32> -> vector<16x128xf32>
    %8 = vector.broadcast %3 : vector<16x1xf32> to vector<16x128xf32>
    %9 = arith.addf %7, %8 : vector<16x128xf32>
    %c0_7 = arith.constant 0 : index
    %c0_8 = arith.constant 0 : index
    %10 = vector.load %arg9[%c0_7, %c0_8] : memref<16x1xf32, #tpu.memory_space<vmem>>, vector<16x1xf32>
    %cst_9 = arith.constant dense<0.000000e+00> : vector<16xf32>
    %11 = vector.multi_reduction <add>, %9, %cst_9 [1] : vector<16x128xf32> to vector<16xf32>
    %12 = vector.shape_cast %11 : vector<16xf32> to vector<16x1xf32>
    %13 = arith.addf %10, %12 : vector<16x1xf32>
    %c0_10 = arith.constant 0 : index
    %c0_11 = arith.constant 0 : index
    %14 = vector.load %arg9[%c0_10, %c0_11] : memref<16x1xf32, #tpu.memory_space<vmem>>, vector<16x1xf32>
    tpu.vector_store %arg9[%c0_10, %c0_11], %13 {strides = array<i32>} : memref<16x1xf32, #tpu.memory_space<vmem>>, vector<16x1xf32>,
    %c0_12 = arith.constant 0 : index
    %c0_13 = arith.constant 0 : index
    %15 = vector.load %arg10[%c0_12, %c0_13] : memref<16x1xf32, #tpu.memory_space<vmem>>, vector<16x1xf32>
    %16 = arith.mulf %9, %9 : vector<16x128xf32>
    %cst_14 = arith.constant dense<0.000000e+00> : vector<16xf32>
    %17 = vector.multi_reduction <add>, %16, %cst_14 [1] : vector<16x128xf32> to vector<16xf32>
    %18 = vector.shape_cast %17 : vector<16xf32> to vector<16x1xf32>
    %19 = arith.addf %15, %18 : vector<16x1xf32>
    %c0_15 = arith.constant 0 : index
    %c0_16 = arith.constant 0 : index
    %20 = vector.load %arg10[%c0_15, %c0_16] : memref<16x1xf32, #tpu.memory_space<vmem>>, vector<16x1xf32>
    tpu.vector_store %arg10[%c0_15, %c0_16], %19 {strides = array<i32>} : memref<16x1xf32, #tpu.memory_space<vmem>>, vector<16x1xf32>,
    %c0_17 = arith.constant 0 : index
    %c0_18 = arith.constant 0 : index
    %c0_19 = arith.constant 0 : index
    %21 = vector.load %arg7[%c0_17, %c0_18, %c0_19] : memref<1x16x128xf32, #tpu.memory_space<vmem>>, vector<1x16x128xf32>
    %22 = vector.shape_cast %21 : vector<1x16x128xf32> to vector<16x128xf32>
    %23 = vector.shape_cast %9 : vector<16x128xf32> to vector<1x16x128xf32>
    tpu.vector_store %arg7[%c0_17, %c0_18, %c0_19], %23 {strides = array<i32>} : memref<1x16x128xf32, #tpu.memory_space<vmem>>, vector<1x16x128xf32>,
    %c1_i32 = arith.constant 1 : i32
    %24 = arith.cmpi eq, %arg1, %c1_i32 : i32
    %25 = arith.extui %24 : i1 to i32
    %c0_i32_20 = arith.constant 0 : i32
    %26 = arith.cmpi ne, %25, %c0_i32_20 : i32
    scf.if %26 {
      %c0_21 = arith.constant 0 : index
      %c0_22 = arith.constant 0 : index
      %27 = vector.load %arg6[%c0_21, %c0_22] : memref<8x16xf32, #tpu.memory_space<vmem>>, vector<8x16xf32>
      %c0_23 = arith.constant 0 : index
      %c0_24 = arith.constant 0 : index
      %28 = vector.load %arg9[%c0_23, %c0_24] : memref<16x1xf32, #tpu.memory_space<vmem>>, vector<16x1xf32>
      %cst_25 = arith.constant dense<0.000000e+00> : vector<8x1xf32>
      %29 = tpu.matmul %27, %28, %cst_25 {dimension_numbers = #tpu.dot_dimension_numbers<[1], [0], [0], [1], [0, 0, 1, 1], [], []>} : vector<8x16xf32>, vector<16x1xf32>, vector<8x1xf32> -> vector<8x1xf32>
      %c0_26 = arith.constant 0 : index
      %c0_27 = arith.constant 0 : index
      %30 = vector.load %arg6[%c0_26, %c0_27] : memref<8x16xf32, #tpu.memory_space<vmem>>, vector<8x16xf32>
      %c0_28 = arith.constant 0 : index
      %c0_29 = arith.constant 0 : index
      %31 = vector.load %arg10[%c0_28, %c0_29] : memref<16x1xf32, #tpu.memory_space<vmem>>, vector<16x1xf32>
      %cst_30 = arith.constant dense<0.000000e+00> : vector<8x1xf32>
      %32 = tpu.matmul %30, %31, %cst_30 {dimension_numbers = #tpu.dot_dimension_numbers<[1], [0], [0], [1], [0, 0, 1, 1], [], []>} : vector<8x16xf32>, vector<16x1xf32>, vector<8x1xf32> -> vector<8x1xf32>
      %cst_31 = arith.constant 5.120000e+02 : f32
      %33 = vector.broadcast %cst_31 : f32 to vector<8x1xf32>
      %34 = arith.divf %29, %33 : vector<8x1xf32>
      %cst_32 = arith.constant 5.120000e+02 : f32
      %35 = vector.broadcast %cst_32 : f32 to vector<8x1xf32>
      %36 = arith.divf %32, %35 : vector<8x1xf32>
      %37 = arith.mulf %34, %34 : vector<8x1xf32>
      %38 = arith.subf %36, %37 : vector<8x1xf32>
      %cst_33 = arith.constant 9.99999974E-6 : f32
      %39 = vector.broadcast %cst_33 : f32 to vector<8x1xf32>
      %40 = arith.addf %38, %39 : vector<8x1xf32>
      %41 = math.rsqrt %40 : vector<8x1xf32>
      %c0_34 = arith.constant 0 : index
      %c0_35 = arith.constant 0 : index
      %42 = vector.load %arg5[%c0_34, %c0_35] : memref<16x8xf32, #tpu.memory_space<vmem>>, vector<16x8xf32>
      %cst_36 = arith.constant dense<0.000000e+00> : vector<16x1xf32>
      %43 = tpu.matmul %42, %34, %cst_36 {dimension_numbers = #tpu.dot_dimension_numbers<[1], [0], [0], [1], [0, 0, 1, 1], [], []>} : vector<16x8xf32>, vector<8x1xf32>, vector<16x1xf32> -> vector<16x1xf32>
      %c0_37 = arith.constant 0 : index
      %c0_38 = arith.constant 0 : index
      %44 = vector.load %arg5[%c0_37, %c0_38] : memref<16x8xf32, #tpu.memory_space<vmem>>, vector<16x8xf32>
      %cst_39 = arith.constant dense<0.000000e+00> : vector<16x1xf32>
      %45 = tpu.matmul %44, %41, %cst_39 {dimension_numbers = #tpu.dot_dimension_numbers<[1], [0], [0], [1], [0, 0, 1, 1], [], []>} : vector<16x8xf32>, vector<8x1xf32>, vector<16x1xf32> -> vector<16x1xf32>
      %c0_40 = arith.constant 0 : index
      %c1 = arith.constant 1 : index
      %46 = vector.load %arg4[%c0_40, %c1] : memref<16x3xf32, #tpu.memory_space<vmem>>, vector<16x1xf32>
      %c0_41 = arith.constant 0 : index
      %c2 = arith.constant 2 : index
      %47 = vector.load %arg4[%c0_41, %c2] : memref<16x3xf32, #tpu.memory_space<vmem>>, vector<16x1xf32>
      %48 = arith.mulf %45, %46 : vector<16x1xf32>
      %49 = arith.mulf %43, %48 : vector<16x1xf32>
      %50 = arith.subf %47, %49 : vector<16x1xf32>
      %51 = tpu.concatenate %48, %50 in 1 : vector<16x1xf32>, vector<16x1xf32> -> vector<16x2xf32>
      %c0_42 = arith.constant 0 : index
      %c0_43 = arith.constant 0 : index
      %c0_44 = arith.constant 0 : index
      %52 = vector.load %arg8[%c0_42, %c0_43, %c0_44] : memref<1x16x2xf32, #tpu.memory_space<vmem>>, vector<1x16x2xf32>
      %53 = vector.shape_cast %52 : vector<1x16x2xf32> to vector<16x2xf32>
      %54 = vector.shape_cast %51 : vector<16x2xf32> to vector<1x16x2xf32>
      tpu.vector_store %arg8[%c0_42, %c0_43, %c0_44], %54 {strides = array<i32>} : memref<1x16x2xf32, #tpu.memory_space<vmem>>, vector<1x16x2xf32>,
    } else {
    }
    return
  }
  func.func @transform_0(%arg0: i32, %arg1: i32) -> (i32, i32, i32) {
    %c0_i32 = arith.constant 0 : i32
    %c0_i32_0 = arith.constant 0 : i32
    return %arg0, %c0_i32, %arg1 : i32, i32, i32
  }
  func.func @transform_1(%arg0: i32, %arg1: i32) -> (i32, i32) {
    %c0_i32 = arith.constant 0 : i32
    %c0_i32_0 = arith.constant 0 : i32
    %c0_i32_1 = arith.constant 0 : i32
    return %c0_i32, %c0_i32_0 : i32, i32
  }
  func.func @transform_2(%arg0: i32, %arg1: i32) -> (i32, i32) {
    %c0_i32 = arith.constant 0 : i32
    %c0_i32_0 = arith.constant 0 : i32
    %c0_i32_1 = arith.constant 0 : i32
    return %c0_i32, %c0_i32_0 : i32, i32
  }
  func.func @transform_3(%arg0: i32, %arg1: i32) -> (i32, i32) {
    %c0_i32 = arith.constant 0 : i32
    %c0_i32_0 = arith.constant 0 : i32
    %c0_i32_1 = arith.constant 0 : i32
    return %c0_i32, %c0_i32_0 : i32, i32
  }
  func.func @transform_4(%arg0: i32, %arg1: i32) -> (i32, i32) {
    %c0_i32 = arith.constant 0 : i32
    %c0_i32_0 = arith.constant 0 : i32
    %c0_i32_1 = arith.constant 0 : i32
    return %c0_i32, %c0_i32_0 : i32, i32
  }
  func.func @transform_5(%arg0: i32, %arg1: i32) -> (i32, i32, i32) {
    %c0_i32 = arith.constant 0 : i32
    %c0_i32_0 = arith.constant 0 : i32
    return %arg0, %c0_i32, %arg1 : i32, i32, i32
  }
  func.func @transform_6(%arg0: i32, %arg1: i32) -> (i32, i32, i32) {
    %c0_i32 = arith.constant 0 : i32
    %c0_i32_0 = arith.constant 0 : i32
    %c0_i32_1 = arith.constant 0 : i32
    return %arg0, %c0_i32, %c0_i32_0 : i32, i32, i32
  }
}

</mosaic_0001>

<bundles_post_ra>
// kernel: tpu_custom_call.1
= control target key start
LH: loop header
LB: loop body
LE: loop exit
PB: predicated region body
PF: predicated region fallthrough
CT: control target
= control target key end

     0   :  { %12 = vsyncpa [#allocation5], 0  ;;  %s1217_s0 = inlined_call_operand.hbm [shape: bf16[2,48,256], index: 0, kind: input, shape index: {}]   ;;  %s1218_s1 = inlined_call_operand.vmem [shape: bf16[16,48], index: 1, kind: input, shape index: {}]   ;;  %s1219_s2 = inlined_call_operand.vmem [shape: f32[16,3], index: 2, kind: input, shape index: {}]   ;;  %s1220_s3 = inlined_call_operand.vmem [shape: f32[16,8], index: 3, kind: input, shape index: {}]   ;;  %s1221_s4 = inlined_call_operand.vmem [shape: f32[8,16], index: 4, kind: input, shape index: {}]   ;;  %s1222_s5 = inlined_call_operand.hbm [shape: f32[2,16,256], index: 5, kind: output, shape index: {0}]   ;;  %s1223_s6 = inlined_call_operand.vmem [shape: f32[2,16,2], index: 6, kind: output, shape index: {1}]  }
   0x1   :  { %14 = vsyncpa [#allocation5 + $0x1], 0 }
   0x2   :  { %15 = vsyncpa [#allocation6], 0 }
   0x3   :  { %17 = vsyncpa [#allocation6 + $0x1], 0  ;;  %s1020_s21 = smov 0   ;;  %s1022_s22 = smov 0  }
   0x4   :  { %s1024_s23 = smov 0   ;;  %s1026_s24 = smov 0  }
   0x5   :  { %s1028_s25 = smov 0   ;;  %s1030_s26 = smov 0  }
   0x6   :  { %s1032_s27 = smov 0   ;;  %s1034_s28 = smov 0  }
   0x7 LB: > { %1229 = sst [smem:[#allocation10_spill]] %s944_s21  ;;  %s703_s29 = sadd.s32 4294967295, %s972_s28   ;;  %s972_s28 = sphi %s1034_s28, %s23_s28   ;;  %s968_s27 = sphi %s1032_s27, %s1251_s27   ;;  %s964_s26 = sphi %s1030_s26, %s1250_s26   ;;  %s960_s25 = sphi %s1028_s25, %s1249_s25   ;;  %s956_s24 = sphi %s1026_s24, %s1248_s24   ;;  %s952_s23 = sphi %s1024_s23, %s1247_s23   ;;  %s948_s22 = sphi %s1022_s22, %s1246_s22   ;;  %s944_s21 = sphi %s1020_s21, %s1245_s21  }
   0x8   : > { %1230 = sst [smem:[#allocation11_spill]] %s952_s23  ;;  %s704_s30 = sadd.s32 4294967294, %s972_s28  }
   0x9   : > { %s32_s7 = sadd.s32 1, %s964_s26  ;;  %s35_s8 = sadd.s32 1, %s968_s27 }
   0xa   : > { %p33_p0 = scmp.ge.s32.totalorder %s32_s7, 2  ;;  %s44_s9 = sadd.s32 1, %s952_s23 }
   0xb   : > { %p51_p1 = scmp.ne.s32.totalorder %s952_s23, %s948_s22  ;;  %p52_p2 = scmp.eq.s32.totalorder %s972_s28, 0 }
   0xc   : > { %s1253_s7 = smov (%p33_p0, %s32_s7), 0  ;;  %s1255_s8 = smov (!%p33_p0, %s35_s8), %s968_s27 }
   0xd   : > { %1231 = sst [smem:[#allocation12_spill]] %s1253_s7  ;;  %s40_s10 = ssub.s32 %s964_s26, %s1253_s7 }
   0xe   : > { %p1073_p3 = por %p52_p2, %p51_p1  ;;  %p37_p4 = scmp.ge.s32.totalorder %s1255_s8, 2 }
   0xf   : > { %p57_p5 = scmp.ne.s32.totalorder %s948_s22, %s944_s21  ;;  %p58_p6 = scmp.eq.s32.totalorder %s703_s29, 0 }
  0x10   : > { %p167_p7 = scmp.eq.s32.totalorder %s703_s29, 3  ;;  %s1257_s8 = smov (%p37_p4, %s1255_s8), 0 }
  0x11   : > { %1233 = sst [smem:[#allocation13_spill]] %s1257_s8  ;;  %p1081_p8 = por %p58_p6, %p57_p5 }
  0x12   : > { %p1085_p9 = por %p167_p7, %p51_p1  ;;  %s39_s14 = ssub.s32 %s968_s27, %s1257_s8 }
  0x13   : > { %p173_p10 = scmp.eq.s32.totalorder %s704_s30, 3  ;;  %s41_s15 = sor.u32 %s40_s10, %s39_s14 }
  0x14   : > { %p42_p11 = scmp.eq.s32.totalorder %s41_s15, 0  ;;  %p762_p13 = scmp.lt.s32.totalorder %s972_s28, 4 }
  0x15   : > { %p1091_p12 = por %p173_p10, %p57_p5  ;;  %s231_s17 = sand.u32 1, %s952_s23  }
  0x16   : > { %s1098_s18 = scalar_select %p42_p11, %s952_s23, %s44_s9  }
  0x17   : > { %s1236_s16 = scalar_select %p1091_p12, 1, 0 }
  0x18   : > { %1238 = sst [smem:[#allocation15_spill]] %s1098_s18  ;;  %s747_s19 = smul.u32 24, %s231_s17 }
  0x19   : > { %1237 = sst [smem:[#allocation14_spill]] %s1236_s16  ;;  %s748_s20 = smul.u32 12, %s968_s27 }
  0x1a   : > { %p755_p0 = pnand %p762_p13, %p1073_p3  ;;  %s235_s7 = scalar_lea.vmem [#allocation4], %s747_s19 }
  0x1b   : > { %s239_s29 = sadd.s32 %s964_s26, %s748_s20  ;;  %s244_s8 = sshll.u32 %s235_s7, 4  ;;  %s245_s8 = int_to_ptr.vmem [resolvable:$true] %s244_s8 }
  0x1c   : > { %s707_s30 = sshll.u32 %s239_s29, 2  ;;  %s232_s21 = scalar_lea.sflag [#allocation5], %s231_s17 }
  0x1d   : > { %s241_s15 = scalar_lea.hbm %s1217_s0, %s707_s30  ;;  %s974_s9 = smov 128  }
  0x1e   : > { %s242_s16 = sshll.u32 %s241_s15, 4  ;;  %s975_s18 = smov 64   ;;  %s243_s16 = int_to_ptr.hbm [resolvable:$true] %s242_s16 }
  0x1f   : > { %s976_s23 = smov 4   ;;  %p708_p1 = scmp.ge.s32.totalorder %s972_s28, 1 }
  0x20   : > { %757 = dma.hbm_to_vmem [thread:$0]  (!%p755_p0), %s243_s16, 384, %s245_s8, %s232_s21, %s974_s9, %s975_s18, %s976_s23  }
  0x21   : > { %p252_p2 = scmp.lt.s32.totalorder %s972_s28, 5 }
  0x23   : > { %p253_p4 = pnand %p708_p1, %p252_p2 }
  0x24   : > { %s1110_s7 = sand.u32 (!%p253_p4), 1, %s948_s22  }
  0x25   : > { %256 = sbr.rel (%p253_p4) target bundleno = 859 (0x35b), region = 40  ;;  %s259_s19 = scalar_lea.sflag (!%p253_p4), [#allocation5], %s1110_s7 }
  0x26   : > { %s749_s11 = smul.u32 (!%p253_p4), 24, %s1110_s7 }
  0x28   : > { %s262_s20 = scalar_lea.vmem (!%p253_p4), [#allocation4], %s749_s11 }
  0x2a   : > { %935 = dma.done.wait (%p1081_p8), %s259_s19, 384  }
  0x2b   : > { %937 = vsyncadd (%p1081_p8), %s259_s19, 4294966912  ;;  %s709_s21 = sshll.u32 %s1110_s7, 4  ;;  %p297_p3 = scmp.lt.s32.totalorder %s960_s25, 1 }
  0x2c   : > { %s1126_s29 = scalar_lea.vmem [#allocation7], %s709_s21  ;;  %p712_p5 = scmp.ne.s32.totalorder %s956_s24, 0 }
  0x2d   : > { %s298_s23 = scalar_select %p297_p3, %s960_s25, 1 }
  0x2e   : > { %306 = sbr.rel (%p712_p5) target bundleno = 56 (0x38), region = 48 }
  0x2f   : > { %s742_s8 = sshll.u32 %s298_s23, 4 }
  0x30   : > { %s1124_s18 = scalar_lea.vmem %s1223_s6, %s742_s8 }
  0x33   : > { %vm307_vm0 = vcmask 7168   ;;  %v977_v0 = vmov 0.0  }
  0x34   : > { %308 = vst.msk [vmem:[#allocation2] sm:$0xff] %vm307_vm0, %v977_v0 }
  0x35   : > { %309 = vst.msk [vmem:[#allocation2 + $0x8] sm:$0xff] %vm307_vm0, %v977_v0 }
  0x36   : > { %310 = vst.msk [vmem:[#allocation3] sm:$0xff] %vm307_vm0, %v977_v0 }
  0x37   : > { %311 = vst.msk [vmem:[#allocation3 + $0x8] sm:$0xff] %vm307_vm0, %v977_v0 }
  0x38 PF: > { %v746_v1 = vld [vmem:[%s262_s20 + $0x10] sm:$0xff]  ;;  %v978_v2 = vmov 0   ;;  %v312_v3 = vld [vmem:[%s1219_s2] sm:$0xff]  ;;  %vm355_vm1 = vcmask 392192   ;;  %vm381_vm2 = vcmask 7168   ;;  %p730_p6 = scmp.ne.s32.totalorder %s956_s24, 1 }
  0x39   : > { %839 = vset.pattern.permute.xlu0 %v978_v2  ;;  %364 = vmatpush.bf16.msra.mxu0 %v746_v1  ;;  %v745_v4 = vld [vmem:[%s262_s20 + $0x8] sm:$0xff]  ;;  %v744_v5 = vld [vmem:[%s262_s20] sm:$0xff]  ;;  %s980_s16 = smov (!%p730_p6), 127   ;;  %s981_s14 = smov (!%p730_p6), 2  }
  0x3a   : > { %324 = vperm.xlu0 %839, %v312_v3   ;;  %v313_v6 = vld [vmem:[%s1219_s2 + $0x8] sm:$0xff]  ;;  %v743_v7 = vld [vmem:[%s1218_s1] sm:$0xff] }
  0x3b   : > { %v373_v16 = vld [vmem:[#allocation2] sm:$0xff] }
  0x3c   : > { %v374_v22 = vld [vmem:[#allocation2 + $0x8] sm:$0xff] }
  0x3d   : > { %365 = vmatpush.bf16.msra.mxu0 %v745_v4  ;;  %v384_v18 = vld [vmem:[#allocation3] sm:$0xff] }
  0x3e   : > { %v385_v24 = vld [vmem:[#allocation3 + $0x8] sm:$0xff] }
  0x41   : > { %366 = vmatpush.bf16.msra.mxu0 %v744_v5 }
  0x42   : > { %329 = vperm.xlu0 %839, %v313_v6  }
  0x44   : > { %729 = vmatmul.msk.bf16.vlgmr.msra.gmra.mxu0 %vm355_vm1, %v743_v7 }
  0xac   : > { %v325_v8 = vpop.permute.xlu0 %324 }
  0xb4   : > { %v330_v12 = vpop.permute.xlu0 %329 }
  0xc1   : > { %v368_v9 = vpop.f32.mrf.mxu0 }
  0xc2   : > { %v369_v10 = vadd.f32 %v368_v9, %v325_v8 }
  0xc4   : > { %396 = vst [vmem:[%s1126_s29] sm:$0xff] %v369_v10  ;;  %375 = vadd.xlane.f32.xlu1 %v369_v10  ;;  %v386_v11 = vmul.f32 %v369_v10, %v369_v10 }
  0xc6   : > { %388 = vadd.xlane.f32.xlu2 %v386_v11 }
  0xc9   : > { %v370_v13 = vpop.f32.mrf.mxu0 }
  0xca   : > { %v371_v14 = vadd.f32 %v370_v13, %v330_v12 }
  0xcc   : > { %397 = vst [vmem:[%s1126_s29 + $0x8] sm:$0xff] %v371_v14  ;;  %377 = vadd.xlane.f32.xlu1 %v371_v14  ;;  %v387_v15 = vmul.f32 %v371_v14, %v371_v14 }
  0xce   : > { %390 = vadd.xlane.f32.xlu2 %v387_v15 }
 0x137   : > { %v376_v17 = vpop.xlane.xlu1 %375 }
 0x138   : > { %v379_v19 = vadd.f32 %v376_v17, %v373_v16 }
 0x139   : > { %v389_v20 = vpop.xlane.xlu2 %388 }
 0x13a   : > { %382 = vst.msk [vmem:[#allocation2] sm:$0xff] %vm381_vm2, %v379_v19  ;;  %v392_v21 = vadd.f32 %v389_v20, %v384_v18 }
 0x13c   : > { %394 = vst.msk [vmem:[#allocation3] sm:$0xff] %vm381_vm2, %v392_v21 }
 0x13f   : > { %v378_v23 = vpop.xlane.xlu1 %377 }
 0x140   : > { %v380_v25 = vadd.f32 %v378_v23, %v374_v22  ;;  %401 = sbr.rel (%p730_p6) target bundleno = 840 (0x348), region = 52 }
 0x141   : > { %v391_v26 = vpop.xlane.xlu2 %390 }
 0x142   : > { %383 = vst.msk [vmem:[#allocation2 + $0x8] sm:$0xff] %vm381_vm2, %v380_v25  ;;  %v393_v27 = vadd.f32 %v391_v26, %v385_v24 }
 0x144   : > { %395 = vst.msk [vmem:[#allocation3 + $0x8] sm:$0xff] %vm381_vm2, %v393_v27 }
 0x145   : > { %v403_v29 = vld [vmem:[#allocation2] sm:$0xff]  ;;  %vm405_vm3 = vcmask 130048   ;;  %v429_v32 = vld [vmem:[#allocation3] sm:$0xff]  ;;  %v979_v33 = vmov 512.0   ;;  %vm475_vm5 = vcmask 64512   ;;  %v529_v49 = vld [vmem:[%s1219_s2 + $0x8] sm:$0xff] }
 0x146   : > { %v402_v31 = vld [vmem:[%s1221_s4] sm:$0xff]  ;;  %840 = vrcp.f32 %v979_v33  ;;  %v474_v50 = vld [vmem:[%s1220_s3 + $0x8] sm:$0xff]  ;;  %vm562_vm9 = vcmask 15360  }
 0x147   : > { %v473_v45 = vld [vmem:[%s1220_s3] sm:$0xff] }
 0x148   : > { %v528_v46 = vld [vmem:[%s1219_s2] sm:$0xff] }
 0x149   : > { %v404_v28 = vld [vmem:[#allocation2 + $0x8] sm:$0xff]  ;;  %532 = vrot.lane.b32.xlu0 %v528_v46, %s980_s16 }
 0x14a   : > { %423 = vmatpush.msra.mxu0 %v404_v28 }
 0x14b   : > { %v430_v30 = vld [vmem:[#allocation3 + $0x8] sm:$0xff] }
 0x14c   : > { %445 = vmatpush.msra.mxu1 %v430_v30  ;;  %424 = vmatpush.msra.mxu0 %v403_v29  ;;  %v841_v34 = vpop.eup %840 }
 0x14d   : > { %731 = vmatmul.msk.f32.vlgmr.msra.gmra.mxu0 %vm405_vm3, %v402_v31  ;;  %v452_v35 = vmul.f32 512.0, %v841_v34  ;;  %vm456_vm4 = vweird.f32 %v841_v34 }
 0x14e   : > { %446 = vmatpush.msra.mxu1 %v429_v32 }
 0x14f   : > { %732 = vmatmul.msk.f32.vlgmr.msra.gmra.mxu1 %vm405_vm3, %v402_v31  ;;  %v453_v36 = vsub.f32 1.0, %v452_v35 }
 0x151   : > { %v454_v37 = vmul.f32 %v841_v34, %v453_v36  ;;  %534 = vrot.lane.b32.xlu0 %v529_v49, %s980_s16 }
 0x153   : > { %v455_v38 = vadd.f32 %v841_v34, %v454_v37 }
 0x155   : > { %v457_v39 = vsel %vm456_vm4, %v841_v34, %v455_v38 }
 0x1bb   : > { %v533_v58 = vpop.permute.xlu0 %532 }
 0x1c3   : > { %v535_v63 = vpop.permute.xlu0 %534 }
 0x1ca   : > { %v426_v40 = vpop.f32.mrf.mxu0 }
 0x1cb   : > { %v458_v42 = vmul.f32 %v457_v39, %v426_v40 }
 0x1cc   : > { %v448_v41 = vpop.f32.mrf.mxu1 }
 0x1cd   : > { %v459_v43 = vmul.f32 %v457_v39, %v448_v41  ;;  %v460_v44 = vmul.f32 %v458_v42, %v458_v42  ;;  %497 = vmatpush.msra.mxu2 %v458_v42 }
 0x1ce   : > { %733 = vmatmul.msk.f32.vlgmr.msra.gmra.mxu2 %vm475_vm5, %v473_v45 }
 0x1cf   : > { %v461_v47 = vsub.f32 %v459_v43, %v460_v44 }
 0x1d1   : > { %v462_v48 = vadd.f32 1e-05, %v461_v47 }
 0x1d3   : > { %842 = vrsqrt.f32 %v462_v48  ;;  %vm469_vm7 = vweird.f32 %v462_v48 }
 0x1d6   : > { %734 = vmatmul.msk.f32.gmra.mxu2 %vm475_vm5, %v474_v50 }
 0x1d9   : > { %v843_v51 = vpop.eup %842 }
 0x1da   : > { %v464_v52 = vmul.f32 %v843_v51, %v462_v48  ;;  %vm470_vm6 = vweird.f32 %v843_v51 }
 0x1db   : > { %vm471_vm8 = vmor %vm469_vm7, %vm470_vm6 }
 0x1dc   : > { %v465_v53 = vmul.f32 %v843_v51, %v464_v52 }
 0x1de   : > { %v466_v54 = vmul.f32 0.5, %v465_v53 }
 0x1e0   : > { %v467_v55 = vsub.f32 1.5, %v466_v54 }
 0x1e2   : > { %v468_v56 = vmul.f32 %v843_v51, %v467_v55 }
 0x1e4   : > { %v472_v57 = vsel %vm471_vm8, %v843_v51, %v468_v56 }
 0x1e5   : > { %520 = vmatpush.msra.mxu3 %v472_v57 }
 0x1e6   : > { %735 = vmatmul.msk.f32.vlgmr.msra.gmra.mxu3 %vm475_vm5, %v473_v45 }
 0x1ee   : > { %736 = vmatmul.msk.f32.gmra.mxu3 %vm475_vm5, %v474_v50 }
 0x251   : > { %v499_v59 = vpop.f32.mrf.mxu2 }
 0x259   : > { %v502_v1 = vpop.f32.mrf.mxu2 }
 0x269   : > { %v522_v60 = vpop.f32.mrf.mxu3 }
 0x26a   : > { %v538_v61 = vmul.f32 %v533_v58, %v522_v60 }
 0x26c   : > { %v540_v62 = vmul.f32 %v538_v61, %v499_v59 }
 0x26e   : > { %544 = vrot.lane.b32.xlu1 %v540_v62, %s981_s14 }
 0x271   : > { %v525_v0 = vpop.f32.mrf.mxu3 }
 0x272   : > { %v539_v2 = vmul.f32 %v535_v63, %v525_v0 }
 0x274   : > { %v541_v3 = vmul.f32 %v539_v2, %v502_v1 }
 0x276   : > { %546 = vrot.lane.b32.xlu1 %v541_v3, %s981_s14 }
 0x2e0   : > { %v545_v4 = vpop.permute.xlu1 %544 }
 0x2e1   : > { %v550_v5 = vsub.f32 %v528_v46, %v545_v4 }
 0x2e3   : > { %554 = vrot.lane.b32.xlu2 %v550_v5, %s980_s16 }
 0x2e8   : > { %v547_v6 = vpop.permute.xlu1 %546 }
 0x2e9   : > { %v551_v7 = vsub.f32 %v529_v49, %v547_v6 }
 0x2eb   : > { %556 = vrot.lane.b32.xlu2 %v551_v7, %s980_s16 }
 0x33d   : > { %v555_v8 = vpop.permute.xlu2 %554 }
 0x33e   : > { %v560_v9 = vsel %vm381_vm2, %v538_v61, %v555_v8 }
 0x33f   : > { %563 = vst.msk [vmem:[%s1124_s18] sm:$0xff] %vm562_vm9, %v560_v9 }
 0x345   : > { %v557_v10 = vpop.permute.xlu2 %556 }
 0x346   : > { %v561_v11 = vsel %vm381_vm2, %v539_v2, %v557_v10 }
 0x347   : > { %564 = vst.msk [vmem:[%s1124_s18 + $0x8] sm:$0xff] %vm562_vm9, %v561_v11 }
 0x348 PF: > { %s738_s15 = sshll.u32 %s960_s25, 2  ;;  %s584_s11 = sshll.u32 %s1126_s29, 4  ;;  %s585_s11 = int_to_ptr.vmem [resolvable:$true] %s584_s11 }
 0x349   : > { %s581_s9 = sadd.s32 %s956_s24, %s738_s15  ;;  %s566_s16 = scalar_lea.sflag [#allocation6], %s1110_s7 }
 0x34a   : > { %s739_s19 = sshll.u32 %s581_s9, 3  ;;  %s894_s24 = scalar_lea.hbm %s1222_s5, 64 }
 0x34b   : > { %s583_s23 = scalar_lea.hbm %s1222_s5, %s739_s19 }
 0x34c   : > { %s586_s8 = sshll.u32 %s583_s23, 4  ;;  %s587_s8 = int_to_ptr.hbm [resolvable:$true] %s586_s8 }
 0x34d   : > { %s888_s17 = sshra.s32 %s587_s8, 4  ;;  %s889_s17 = int_to_ptr.hbm [resolvable:$true] %s888_s17 }
 0x34e   : > { %s890_s18 = scalar_lea.hbm %s889_s17, 16  ;;  %p895_p11 = scmp.lt.s32.totalorder %s889_s17, %s1222_s5 }
 0x34f   : > { %p891_p7 = scmp.ne.s32.totalorder %s889_s17, %s890_s18  ;;  %p896_p13 = scmp.lt.s32.totalorder %s894_s24, %s890_s18 }
 0x351   : > { %p892_p8 = pnand %p891_p7, %p1085_p9  ;;  %p897_p0 = por %p896_p13, %p895_p11 }
 0x353   : > { %p893_p10 = pneg %p892_p8 }
 0x355   : > { %p898_p1 = pnand %p897_p0, %p893_p10 }
 0x357   : > { %901 = shalt.err (!%p898_p1)
}
 0x358   : > { %s982_s7 = smov 128   ;;  %s983_s10 = smov 256  }
 0x359   : > { %s984_s14 = smov 8  }
 0x35a   : > { %752 = dma.vmem_to_hbm [thread:$0]  (%p1085_p9), %s585_s11, 256, %s587_s8, %s566_s16, %s982_s7, %s983_s10, %s984_s14  }
 0x35b PF: > { %s1239_s15 = sld [smem:[#allocation10_spill]]  ;;  %p763_p2 = scmp.ge.s32.totalorder %s972_s28, 2 }
 0x35d   : > { %p759_p4 = pnand %p763_p2, %p1091_p12 }
 0x35f   : > { %p760_p3 = pneg %p759_p4 }
 0x361   : > { %s604_s19 = sand.u32 1, %s1239_s15  }
 0x362   : > { %s605_s20 = scalar_lea.sflag [#allocation6], %s604_s19 }
 0x363   : > { %939 = dma.done.wait (%p760_p3), %s605_s20, 256  }
 0x364   : > { %941 = vsyncadd (%p760_p3), %s605_s20, 4294967040  ;;  %s23_s28 = sadd.s32 1, %s972_s28   ;;  %s1241_s23 = sld [smem:[#allocation11_spill]] }
 0x365   : > { %p20_p5 = scmp.ge.s32.totalorder %s23_s28, 6   ;;  %s1242_s17 = sld [smem:[#allocation15_spill]] }
 0x366   : > { %s1243_s13 = sld [smem:[#allocation12_spill]]  ;;  %s1245_s21 = smov %s948_s22 }
 0x367   : > { %s1244_s11 = sld [smem:[#allocation13_spill]]  ;;  %s1248_s24 = smov %s964_s26 }
 0x368   : > { %s1249_s25 = smov %s968_s27 }
 0x369   :  { %22 = sbr.rel (!%p20_p5) target bundleno = 7 (0x7), region = 105 }
 0x36a   : > { %s1246_s22 = smov %s1241_s23 }
 0x36b   : > { %s1247_s23 = smov %s1242_s17 }
 0x36c   : > { %s1250_s26 = smov %s1243_s13 }
 0x36d   : > { %s1251_s27 = smov %s1244_s11 }
 0x36e   :  { %619 = vsyncpa [#allocation5], 1 }
 0x36f   :  { %621 = vsyncpa [#allocation5 + $0x1], 1 }
 0x370   :  { %622 = vsyncpa [#allocation6], 1 }
 0x371   :  { %624 = vsyncpa [#allocation6 + $0x1], 1 }

</bundles_post_ra>
